<compile_context>
chip_gen: v7x
topology: tpu7x:2x2x1
jax: 0.10.0
libtpu: 0.0.40
codegen_flags: <defaults>
</compile_context>

<pallas_src>
import math

import jax
import jax.numpy as jnp
from jax.experimental import pallas as pl
from jax.experimental.pallas import tpu as pltpu

_HIDDEN = 100        # reference hidden width: nn.Linear(3*(Dt+Dn), 100)
_HIDDEN_PAD = 128    # MXU/lane aligned hidden width


def _choose_tm(num_edge):
    """Largest row tile with small padding waste and (if possible) >= 2 tiles."""
    base = -(-num_edge // 8) * 8
    best = 8
    for cand in (8, 16, 32, 64, 128, 256, 512, 1024, 2048):
        if cand > base:
            break
        m_pad = -(-num_edge // cand) * cand
        if m_pad > 1.125 * base:                  # too much padded-row waste
            continue
        if m_pad // cand < 2 and base > 8:        # keep >= 2 tiles for megacore
            continue
        best = cand
    return best


def _edge_mlp_kernel(src1_ref, src2_ref, pd1_ref, pd2_ref, nd1_ref, nd2_ref,
                     w1s_ref, w1ab_ref, b1_ref, w2bd_ref, b2_ref, o_ref):
    """One row-tile of the fused 2-layer MLP over all four edge sets."""
    f32 = jnp.float32
    cdt = w1s_ref.dtype                      # compute dtype (f32 or bf16)
    hp = w1s_ref.shape[1]                    # padded hidden width (128)

    src = (src1_ref[...] + src2_ref[...]).astype(cdt)   # fused h_src1 + h_src2
    pd1 = pd1_ref[...].astype(cdt)
    pd2 = pd2_ref[...].astype(cdt)
    nd1 = nd1_ref[...].astype(cdt)
    nd2 = nd2_ref[...].astype(cdt)

    w1ab = w1ab_ref[...]
    w1a = w1ab[:, :hp]
    w1b = w1ab[:, hp:]

    # ---- layer 1: 5 MXU dots.  The shared src projection (with b1 folded in
    # once) is reused by all four heads; pd2/nd1 need both W1 halves so they
    # use the fused 256-lane weight in a single dot each. ----
    s_b1   = jnp.dot(src, w1s_ref[...], preferred_element_type=f32) + b1_ref[...]
    a_pd1  = jnp.dot(pd1, w1a, preferred_element_type=f32)    # pos, neg2
    b_nd2  = jnp.dot(nd2, w1b, preferred_element_type=f32)    # neg1, neg2
    ab_pd2 = jnp.dot(pd2, w1ab, preferred_element_type=f32)   # pos (b), neg3 (a)
    ab_nd1 = jnp.dot(nd1, w1ab, preferred_element_type=f32)   # neg1 (a), neg3 (b)
    a_pd2, b_pd2 = ab_pd2[:, :hp], ab_pd2[:, hp:]
    a_nd1, b_nd1 = ab_nd1[:, :hp], ab_nd1[:, hp:]

    relu = lambda x: jnp.maximum(x, 0.0)
    hid = jnp.concatenate([                   # 128-lane-aligned lane concat
        relu(s_b1 + a_pd1 + b_pd2),           # pos
        relu(s_b1 + a_nd1 + b_nd2),           # neg1
        relu(s_b1 + a_pd1 + b_nd2),           # neg2
        relu(s_b1 + a_pd2 + b_nd1),           # neg3
    ], axis=1)                                # (tm, 4*128)

    # ---- layer 2: one dot against the block-diagonal W2' packs the four
    # heads side by side -> a single lane-dense, unmasked full-width store. ----
    out = jnp.dot(hid.astype(cdt), w2bd_ref[...], preferred_element_type=f32)
    o_ref[...] = (out + b2_ref[...]).astype(o_ref.dtype)


def _edge_mlp_pallas(streams, weights, *, tm, num_edge, packed):
    w1s, w1ab, b1, w2bd, b2 = weights
    d, hp = w1s.shape
    out_w = w2bd.shape[1]                     # 4 * per-head padded width

    if packed:
        # Zero-copy path: `h` is the only row operand, passed six times with
        # static per-set block offsets in the index_maps (no wrapper slices).
        h = streams
        bps = num_edge // tm                  # blocks per edge-set

        def row_spec(set_idx):
            return pl.BlockSpec((tm, d), lambda i, s=set_idx: (i + s * bps, 0))

        # kernel order: src1, src2, pd1, pd2, nd1, nd2  -> set offsets 0,3,1,4,2,5
        in_row_specs = [row_spec(s) for s in (0, 3, 1, 4, 2, 5)]
        operands = (h,) * 6
        m = num_edge
    else:
        operands = streams                    # six pre-sliced (m_pad, d) arrays
        m = streams[0].shape[0]
        in_row_specs = [pl.BlockSpec((tm, d), lambda i: (i, 0)) for _ in range(6)]

    def pinned(a):
        return pl.BlockSpec(a.shape, lambda i: (0, 0))

    grid = m // tm
    esz = jnp.dtype(w1s.dtype).itemsize

    # VMEM budget: double-buffered I/O tiles + resident weights (x2 buffers)
    # + in-kernel intermediates (5 layer-1 results incl. two 256-wide ones,
    # 4 hiddens + their lane concat, one output slab).  Cap at 40 MiB (v7x).
    io_bytes = 2 * (6 * tm * d * 4 + tm * out_w * 4)
    weight_bytes = esz * (d * hp + d * 2 * hp + 4 * hp * out_w) + 4 * (hp + out_w)
    interm_bytes = 4 * tm * (7 * hp + 8 * hp + out_w)
    vmem_limit = int(min(max(io_bytes + 2 * weight_bytes + interm_bytes + (4 << 20),
                             16 << 20), 40 << 20))

    flops = m * (2 * 7 * d * hp + 2 * 4 * hp * out_w)
    bytes_accessed = int(m * (6 * d + out_w) * 4 + weight_bytes)

    return pl.pallas_call(
        _edge_mlp_kernel,
        out_shape=jax.ShapeDtypeStruct((m, out_w), jnp.float32),
        grid_spec=pltpu.PrefetchScalarGridSpec(
            num_scalar_prefetch=0,
            grid=(grid,),
            in_specs=in_row_specs + [pinned(w1s), pinned(w1ab), pinned(b1),
                                     pinned(w2bd), pinned(b2)],
            out_specs=pl.BlockSpec((tm, out_w), lambda i: (i, 0)),
        ),
        compiler_params=pltpu.CompilerParams(
            dimension_semantics=("parallel",),
            vmem_limit_bytes=vmem_limit,
        ),
        cost_estimate=pl.CostEstimate(
            flops=flops, transcendentals=0, bytes_accessed=bytes_accessed),
    )(*operands, w1s, w1ab, b1, w2bd, b2)


def init_edge_predictor_params(key, dim_in_time, dim_in_node, predict_class):
    """nn.Linear-style init (uniform +-1/sqrt(fan_in)); W1 split and padded
    100->128, W2 re-laid-out as a block-diagonal (512, 4*cp) matrix."""
    d = dim_in_time + dim_in_node
    d_in = 3 * d
    k1, k2, k3, k4 = jax.random.split(key, 4)
    bnd1 = 1.0 / math.sqrt(d_in)
    bnd2 = 1.0 / math.sqrt(_HIDDEN)
    w1 = jax.random.uniform(k1, (d_in, _HIDDEN), jnp.float32, -bnd1, bnd1)
    b1 = jax.random.uniform(k2, (_HIDDEN,), jnp.float32, -bnd1, bnd1)
    w2 = jax.random.uniform(k3, (_HIDDEN, predict_class), jnp.float32, -bnd2, bnd2)
    b2 = jax.random.uniform(k4, (predict_class,), jnp.float32, -bnd2, bnd2)

    hp = _HIDDEN_PAD
    cp = -(-predict_class // 32) * 32        # per-head output lanes (mult of 32)

    # Zero padding is numerically inert: relu(0)=0 and the padded W2' rows/cols
    # contribute nothing to the first `predict_class` lanes of each head.
    w1p = jnp.zeros((d_in, hp), jnp.float32).at[:, :_HIDDEN].set(w1)
    w1s = w1p[:d]
    w1ab = jnp.concatenate([w1p[d:2 * d], w1p[2 * d:]], axis=1)      # (d, 256)
    b1p = jnp.zeros((1, hp), jnp.float32).at[0, :_HIDDEN].set(b1)

    # Block-diagonal layer-2: head k reads hidden lanes [128k, 128k+128) and
    # writes output lanes [cp*k, cp*k + predict_class).
    w2bd = jnp.zeros((4 * hp, 4 * cp), jnp.float32)
    b2p = jnp.zeros((1, 4 * cp), jnp.float32)
    for k in range(4):
        w2bd = w2bd.at[k * hp:k * hp + _HIDDEN,
                       k * cp:k * cp + predict_class].set(w2)
        b2p = b2p.at[0, k * cp:k * cp + predict_class].set(b2)

    return {
        "w1s": w1s, "w1ab": w1ab, "b1": b1p, "w2bd": w2bd, "b2": b2p,
        "predict_class": predict_class, "cp_head": cp, "dim": d,
        "ref": (w1, b1, w2, b2),   # unpadded copies for the reference check
    }


def edge_predictor_per_node_forward(params, h, neg_samples=1, perm_key=None,
                                    use_bf16=False):
    """JAX/Pallas port of EdgePredictor_per_node.forward (neg_samples=1)."""
    # TODO(synk): neg_samples > 1 is not implemented — the reference module's
    # slicing/tiling is only self-consistent for neg_samples == 1.
    assert neg_samples == 1, "only neg_samples=1 matches the reference slicing"
    c = params["predict_class"]
    cp = params["cp_head"]
    num_edge = h.shape[0] // (2 * neg_samples + 4)

    w1s, w1ab, w2bd = params["w1s"], params["w1ab"], params["w2bd"]
    if use_bf16:
        # bf16 operands (f32 accumulation) ~2-4x MXU rate on v5e/v7x; slightly
        # perturbs results vs. the strict f32 reference tolerance.
        w1s, w1ab, w2bd = (x.astype(jnp.bfloat16) for x in (w1s, w1ab, w2bd))
    weights = (w1s, w1ab, params["b1"], w2bd, params["b2"])

    tm = _choose_tm(num_edge)
    if num_edge % tm == 0:
        out = _edge_mlp_pallas(h, weights, tm=tm, num_edge=num_edge, packed=True)
    else:
        # Fallback (num_edge not a multiple of 8): slice + zero-pad rows.
        m_pad = -(-num_edge // tm) * tm

        def seg(k):
            x = h[k * num_edge:(k + 1) * num_edge]
            return jnp.pad(x, ((0, m_pad - num_edge), (0, 0)))

        streams = (seg(0), seg(3), seg(1), seg(4), seg(2), seg(5))
        out = _edge_mlp_pallas(streams, weights, tm=tm, num_edge=num_edge,
                               packed=False)

    out = out[:num_edge].reshape(num_edge, 4, cp)[:, :, :c]
    h_pos_edge = out[:, 0]
    h_neg_edge_all = jnp.concatenate([out[:, 1], out[:, 2], out[:, 3]], axis=0)

    num_pos, num_neg = num_edge, 3 * num_edge
    if num_neg > num_pos:
        # torch.randperm analogue (glue, not hot path); gather only the first
        # num_pos permuted indices instead of permuting all rows then slicing.
        if perm_key is None:
            perm_key = jax.random.PRNGKey(42)
        idx = jax.random.permutation(perm_key, num_neg)[:num_pos]
        h_neg_edge = h_neg_edge_all[idx]
    else:
        h_neg_edge = h_neg_edge_all
    return h_pos_edge, h_neg_edge


def _reference_forward(params, h, num_edge, perm_key):
    """Pure-JAX reference (unpadded weights, PyTorch-equivalent math)."""
    w1, b1, w2, b2 = params["ref"]
    src = h[:num_edge] + h[3 * num_edge:4 * num_edge]
    pd1 = h[num_edge:2 * num_edge]
    nd1 = h[2 * num_edge:3 * num_edge]
    pd2 = h[4 * num_edge:5 * num_edge]
    nd2 = h[5 * num_edge:6 * num_edge]
    mlp = lambda x: jnp.maximum(x @ w1 + b1, 0.0) @ w2 + b2
    pos = mlp(jnp.concatenate([src, pd1, pd2], axis=-1))
    neg_all = jnp.concatenate([
        mlp(jnp.concatenate([src, nd1, nd2], axis=-1)),
        mlp(jnp.concatenate([src, pd1, nd2], axis=-1)),
        mlp(jnp.concatenate([src, pd2, nd1], axis=-1)),
    ], axis=0)
    perm = jax.random.permutation(perm_key, 3 * num_edge)
    return pos, neg_all[perm][:num_edge]


if __name__ == "__main__":
    key = jax.random.PRNGKey(0)
    k_param, k_data, k_perm, k_data2, k_perm2 = jax.random.split(key, 5)

    dim_in_time, dim_in_node, predict_class = 24, 8, 4
    d = dim_in_time + dim_in_node                 # 32
    params = init_edge_predictor_params(k_param, dim_in_time, dim_in_node,
                                        predict_class)

    # ---- case 1: num_edge multiple of 8 -> zero-copy packed path ----
    num_edge = 8
    h = jax.random.normal(k_data, ((2 * 1 + 4) * num_edge, d), dtype=jnp.float32)
    h_pos, h_neg = edge_predictor_per_node_forward(params, h, neg_samples=1,
                                                   perm_key=k_perm)
    jax.block_until_ready((h_pos, h_neg))
    assert h_pos.shape == (num_edge, predict_class)
    assert h_neg.shape == (num_edge, predict_class)
    ref_pos, ref_neg = _reference_forward(params, h, num_edge, k_perm)
    assert jnp.allclose(h_pos, ref_pos, atol=1e-4, rtol=1e-4)
    assert jnp.allclose(h_neg, ref_neg, atol=1e-4, rtol=1e-4)

    # ---- case 2: num_edge not a multiple of 8 -> padded fallback path ----
    num_edge2 = 5
    h2 = jax.random.normal(k_data2, ((2 * 1 + 4) * num_edge2, d), dtype=jnp.float32)
    h_pos2, h_neg2 = edge_predictor_per_node_forward(params, h2, neg_samples=1,
                                                     perm_key=k_perm2)
    jax.block_until_ready((h_pos2, h_neg2))
    ref_pos2, ref_neg2 = _reference_forward(params, h2, num_edge2, k_perm2)
    assert jnp.allclose(h_pos2, ref_pos2, atol=1e-4, rtol=1e-4)
    assert jnp.allclose(h_neg2, ref_neg2, atol=1e-4, rtol=1e-4)

    print("KERNEL_OK")
</pallas_src>

<mosaic_0001>
module attributes {stable_mosaic.version = 11 : i64} {
  func.func @_edge_mlp_kernel(%arg0: i32, %arg1: memref<8x32xf32, #tpu.memory_space<vmem>>, %arg2: memref<8x32xf32, #tpu.memory_space<vmem>>, %arg3: memref<8x32xf32, #tpu.memory_space<vmem>>, %arg4: memref<8x32xf32, #tpu.memory_space<vmem>>, %arg5: memref<8x32xf32, #tpu.memory_space<vmem>>, %arg6: memref<8x32xf32, #tpu.memory_space<vmem>>, %arg7: memref<32x128xf32, #tpu.memory_space<vmem>>, %arg8: memref<32x256xf32, #tpu.memory_space<vmem>>, %arg9: memref<1x128xf32, #tpu.memory_space<vmem>>, %arg10: memref<512x128xf32, #tpu.memory_space<vmem>>, %arg11: memref<1x128xf32, #tpu.memory_space<vmem>>, %arg12: memref<8x128xf32, #tpu.memory_space<vmem>>) attributes {dimension_semantics = [#tpu.dimension_semantics<parallel>], iteration_bounds = array<i64: 1>, scalar_prefetch = 0 : i64, scratch_operands = 0 : i64, tpu.core_type = #tpu.core_type<tc>, window_params = [{transform_indices = @transform_0, window_bounds = array<i64: 8, 32>}, {transform_indices = @transform_1, window_bounds = array<i64: 8, 32>}, {transform_indices = @transform_2, window_bounds = array<i64: 8, 32>}, {transform_indices = @transform_3, window_bounds = array<i64: 8, 32>}, {transform_indices = @transform_4, window_bounds = array<i64: 8, 32>}, {transform_indices = @transform_5, window_bounds = array<i64: 8, 32>}, {pipeline_mode = #tpu.pipeline_mode<synchronous>, transform_indices = @transform_6, window_bounds = array<i64: 32, 128>}, {pipeline_mode = #tpu.pipeline_mode<synchronous>, transform_indices = @transform_7, window_bounds = array<i64: 32, 256>}, {pipeline_mode = #tpu.pipeline_mode<synchronous>, transform_indices = @transform_8, window_bounds = array<i64: 1, 128>}, {pipeline_mode = #tpu.pipeline_mode<synchronous>, transform_indices = @transform_9, window_bounds = array<i64: 512, 128>}, {pipeline_mode = #tpu.pipeline_mode<synchronous>, transform_indices = @transform_10, window_bounds = array<i64: 1, 128>}, {transform_indices = @transform_11, window_bounds = array<i64: 8, 128>}]} {
    %c0 = arith.constant 0 : index
    %c0_0 = arith.constant 0 : index
    %0 = vector.load %arg1[%c0, %c0_0] : memref<8x32xf32, #tpu.memory_space<vmem>>, vector<8x32xf32>
    %c0_1 = arith.constant 0 : index
    %c0_2 = arith.constant 0 : index
    %1 = vector.load %arg2[%c0_1, %c0_2] : memref<8x32xf32, #tpu.memory_space<vmem>>, vector<8x32xf32>
    %2 = arith.addf %0, %1 : vector<8x32xf32>
    %c0_3 = arith.constant 0 : index
    %c0_4 = arith.constant 0 : index
    %3 = vector.load %arg3[%c0_3, %c0_4] : memref<8x32xf32, #tpu.memory_space<vmem>>, vector<8x32xf32>
    %c0_5 = arith.constant 0 : index
    %c0_6 = arith.constant 0 : index
    %4 = vector.load %arg4[%c0_5, %c0_6] : memref<8x32xf32, #tpu.memory_space<vmem>>, vector<8x32xf32>
    %c0_7 = arith.constant 0 : index
    %c0_8 = arith.constant 0 : index
    %5 = vector.load %arg5[%c0_7, %c0_8] : memref<8x32xf32, #tpu.memory_space<vmem>>, vector<8x32xf32>
    %c0_9 = arith.constant 0 : index
    %c0_10 = arith.constant 0 : index
    %6 = vector.load %arg6[%c0_9, %c0_10] : memref<8x32xf32, #tpu.memory_space<vmem>>, vector<8x32xf32>
    %c0_11 = arith.constant 0 : index
    %c0_12 = arith.constant 0 : index
    %7 = vector.load %arg8[%c0_11, %c0_12] : memref<32x256xf32, #tpu.memory_space<vmem>>, vector<32x256xf32>
    %8 = vector.extract_strided_slice %7 {offsets = [0, 0], sizes = [32, 128], strides = [1, 1]} : vector<32x256xf32> to vector<32x128xf32>
    %9 = vector.extract_strided_slice %7 {offsets = [0, 128], sizes = [32, 128], strides = [1, 1]} : vector<32x256xf32> to vector<32x128xf32>
    %c0_13 = arith.constant 0 : index
    %c0_14 = arith.constant 0 : index
    %10 = vector.load %arg7[%c0_13, %c0_14] : memref<32x128xf32, #tpu.memory_space<vmem>>, vector<32x128xf32>
    %cst = arith.constant dense<0.000000e+00> : vector<8x128xf32>
    %11 = tpu.matmul %2, %10, %cst {dimension_numbers = #tpu.dot_dimension_numbers<[1], [0], [0], [1], [0, 0, 1, 1], [], []>} : vector<8x32xf32>, vector<32x128xf32>, vector<8x128xf32> -> vector<8x128xf32>
    %c0_15 = arith.constant 0 : index
    %c0_16 = arith.constant 0 : index
    %12 = vector.load %arg9[%c0_15, %c0_16] : memref<1x128xf32, #tpu.memory_space<vmem>>, vector<1x128xf32>
    %13 = vector.broadcast %12 : vector<1x128xf32> to vector<8x128xf32>
    %14 = arith.addf %11, %13 : vector<8x128xf32>
    %cst_17 = arith.constant dense<0.000000e+00> : vector<8x128xf32>
    %15 = tpu.matmul %3, %8, %cst_17 {dimension_numbers = #tpu.dot_dimension_numbers<[1], [0], [0], [1], [0, 0, 1, 1], [], []>} : vector<8x32xf32>, vector<32x128xf32>, vector<8x128xf32> -> vector<8x128xf32>
    %cst_18 = arith.constant dense<0.000000e+00> : vector<8x128xf32>
    %16 = tpu.matmul %6, %9, %cst_18 {dimension_numbers = #tpu.dot_dimension_numbers<[1], [0], [0], [1], [0, 0, 1, 1], [], []>} : vector<8x32xf32>, vector<32x128xf32>, vector<8x128xf32> -> vector<8x128xf32>
    %cst_19 = arith.constant dense<0.000000e+00> : vector<8x256xf32>
    %17 = tpu.matmul %4, %7, %cst_19 {dimension_numbers = #tpu.dot_dimension_numbers<[1], [0], [0], [1], [0, 0, 1, 1], [], []>} : vector<8x32xf32>, vector<32x256xf32>, vector<8x256xf32> -> vector<8x256xf32>
    %cst_20 = arith.constant dense<0.000000e+00> : vector<8x256xf32>
    %18 = tpu.matmul %5, %7, %cst_20 {dimension_numbers = #tpu.dot_dimension_numbers<[1], [0], [0], [1], [0, 0, 1, 1], [], []>} : vector<8x32xf32>, vector<32x256xf32>, vector<8x256xf32> -> vector<8x256xf32>
    %19 = vector.extract_strided_slice %17 {offsets = [0, 0], sizes = [8, 128], strides = [1, 1]} : vector<8x256xf32> to vector<8x128xf32>
    %20 = vector.extract_strided_slice %17 {offsets = [0, 128], sizes = [8, 128], strides = [1, 1]} : vector<8x256xf32> to vector<8x128xf32>
    %21 = vector.extract_strided_slice %18 {offsets = [0, 0], sizes = [8, 128], strides = [1, 1]} : vector<8x256xf32> to vector<8x128xf32>
    %22 = vector.extract_strided_slice %18 {offsets = [0, 128], sizes = [8, 128], strides = [1, 1]} : vector<8x256xf32> to vector<8x128xf32>
    %23 = arith.addf %14, %15 : vector<8x128xf32>
    %24 = arith.addf %23, %20 : vector<8x128xf32>
    %cst_21 = arith.constant 0.000000e+00 : f32
    %25 = vector.broadcast %cst_21 : f32 to vector<8x128xf32>
    %26 = arith.maximumf %24, %25 : vector<8x128xf32>
    %27 = arith.addf %14, %21 : vector<8x128xf32>
    %28 = arith.addf %27, %16 : vector<8x128xf32>
    %cst_22 = arith.constant 0.000000e+00 : f32
    %29 = vector.broadcast %cst_22 : f32 to vector<8x128xf32>
    %30 = arith.maximumf %28, %29 : vector<8x128xf32>
    %31 = arith.addf %14, %15 : vector<8x128xf32>
    %32 = arith.addf %31, %16 : vector<8x128xf32>
    %cst_23 = arith.constant 0.000000e+00 : f32
    %33 = vector.broadcast %cst_23 : f32 to vector<8x128xf32>
    %34 = arith.maximumf %32, %33 : vector<8x128xf32>
    %35 = arith.addf %14, %19 : vector<8x128xf32>
    %36 = arith.addf %35, %22 : vector<8x128xf32>
    %cst_24 = arith.constant 0.000000e+00 : f32
    %37 = vector.broadcast %cst_24 : f32 to vector<8x128xf32>
    %38 = arith.maximumf %36, %37 : vector<8x128xf32>
    %39 = tpu.concatenate %26, %30, %34, %38 in 1 : vector<8x128xf32>, vector<8x128xf32>, vector<8x128xf32>, vector<8x128xf32> -> vector<8x512xf32>
    %c0_25 = arith.constant 0 : index
    %c0_26 = arith.constant 0 : index
    %40 = vector.load %arg10[%c0_25, %c0_26] : memref<512x128xf32, #tpu.memory_space<vmem>>, vector<512x128xf32>
    %cst_27 = arith.constant dense<0.000000e+00> : vector<8x128xf32>
    %41 = tpu.matmul %39, %40, %cst_27 {dimension_numbers = #tpu.dot_dimension_numbers<[1], [0], [0], [1], [0, 0, 1, 1], [], []>} : vector<8x512xf32>, vector<512x128xf32>, vector<8x128xf32> -> vector<8x128xf32>
    %c0_28 = arith.constant 0 : index
    %c0_29 = arith.constant 0 : index
    %42 = vector.load %arg11[%c0_28, %c0_29] : memref<1x128xf32, #tpu.memory_space<vmem>>, vector<1x128xf32>
    %43 = vector.broadcast %42 : vector<1x128xf32> to vector<8x128xf32>
    %44 = arith.addf %41, %43 : vector<8x128xf32>
    %c0_30 = arith.constant 0 : index
    %c0_31 = arith.constant 0 : index
    %45 = vector.load %arg12[%c0_30, %c0_31] : memref<8x128xf32, #tpu.memory_space<vmem>>, vector<8x128xf32>
    tpu.vector_store %arg12[%c0_30, %c0_31], %44 {strides = array<i32>} : memref<8x128xf32, #tpu.memory_space<vmem>>, vector<8x128xf32>,
    return
  }
  func.func @transform_0(%arg0: i32) -> (i32, i32) {
    %c0_i32 = arith.constant 0 : i32
    %0 = arith.addi %arg0, %c0_i32 : i32
    %c0_i32_0 = arith.constant 0 : i32
    %c0_i32_1 = arith.constant 0 : i32
    return %0, %c0_i32_0 : i32, i32
  }
  func.func @transform_1(%arg0: i32) -> (i32, i32) {
    %c3_i32 = arith.constant 3 : i32
    %0 = arith.addi %arg0, %c3_i32 : i32
    %c0_i32 = arith.constant 0 : i32
    %c0_i32_0 = arith.constant 0 : i32
    return %0, %c0_i32 : i32, i32
  }
  func.func @transform_2(%arg0: i32) -> (i32, i32) {
    %c1_i32 = arith.constant 1 : i32
    %0 = arith.addi %arg0, %c1_i32 : i32
    %c0_i32 = arith.constant 0 : i32
    %c0_i32_0 = arith.constant 0 : i32
    return %0, %c0_i32 : i32, i32
  }
  func.func @transform_3(%arg0: i32) -> (i32, i32) {
    %c4_i32 = arith.constant 4 : i32
    %0 = arith.addi %arg0, %c4_i32 : i32
    %c0_i32 = arith.constant 0 : i32
    %c0_i32_0 = arith.constant 0 : i32
    return %0, %c0_i32 : i32, i32
  }
  func.func @transform_4(%arg0: i32) -> (i32, i32) {
    %c2_i32 = arith.constant 2 : i32
    %0 = arith.addi %arg0, %c2_i32 : i32
    %c0_i32 = arith.constant 0 : i32
    %c0_i32_0 = arith.constant 0 : i32
    return %0, %c0_i32 : i32, i32
  }
  func.func @transform_5(%arg0: i32) -> (i32, i32) {
    %c5_i32 = arith.constant 5 : i32
    %0 = arith.addi %arg0, %c5_i32 : i32
    %c0_i32 = arith.constant 0 : i32
    %c0_i32_0 = arith.constant 0 : i32
    return %0, %c0_i32 : i32, i32
  }
  func.func @transform_6(%arg0: i32) -> (i32, i32) {
    %c0_i32 = arith.constant 0 : i32
    %c0_i32_0 = arith.constant 0 : i32
    %c0_i32_1 = arith.constant 0 : i32
    return %c0_i32, %c0_i32_0 : i32, i32
  }
  func.func @transform_7(%arg0: i32) -> (i32, i32) {
    %c0_i32 = arith.constant 0 : i32
    %c0_i32_0 = arith.constant 0 : i32
    %c0_i32_1 = arith.constant 0 : i32
    return %c0_i32, %c0_i32_0 : i32, i32
  }
  func.func @transform_8(%arg0: i32) -> (i32, i32) {
    %c0_i32 = arith.constant 0 : i32
    %c0_i32_0 = arith.constant 0 : i32
    %c0_i32_1 = arith.constant 0 : i32
    return %c0_i32, %c0_i32_0 : i32, i32
  }
  func.func @transform_9(%arg0: i32) -> (i32, i32) {
    %c0_i32 = arith.constant 0 : i32
    %c0_i32_0 = arith.constant 0 : i32
    %c0_i32_1 = arith.constant 0 : i32
    return %c0_i32, %c0_i32_0 : i32, i32
  }
  func.func @transform_10(%arg0: i32) -> (i32, i32) {
    %c0_i32 = arith.constant 0 : i32
    %c0_i32_0 = arith.constant 0 : i32
    %c0_i32_1 = arith.constant 0 : i32
    return %c0_i32, %c0_i32_0 : i32, i32
  }
  func.func @transform_11(%arg0: i32) -> (i32, i32) {
    %c0_i32 = arith.constant 0 : i32
    %c0_i32_0 = arith.constant 0 : i32
    return %arg0, %c0_i32 : i32, i32
  }
}

</mosaic_0001>

<bundles_post_ra>
// kernel: tpu_custom_call.1
= control target key start
LH: loop header
LB: loop body
LE: loop exit
PB: predicated region body
PF: predicated region fallthrough
CT: control target
= control target key end

     0   :  { %16 = vsyncpa [#allocation3], 0  ;;  %s1460_s0 = inlined_call_operand.vmem [shape: f32[48,32], index: 0, kind: input, shape index: {}]   ;;  %s1461_s1 = inlined_call_operand.vmem [shape: f32[48,32], index: 1, kind: input, shape index: {}]   ;;  %s1462_s2 = inlined_call_operand.vmem [shape: f32[48,32], index: 2, kind: input, shape index: {}]   ;;  %s1463_s3 = inlined_call_operand.vmem [shape: f32[48,32], index: 3, kind: input, shape index: {}]   ;;  %s1464_s4 = inlined_call_operand.vmem [shape: f32[48,32], index: 4, kind: input, shape index: {}]   ;;  %s1465_s5 = inlined_call_operand.vmem [shape: f32[48,32], index: 5, kind: input, shape index: {}]   ;;  %s1466_s6 = inlined_call_operand.hbm [shape: f32[32,128], index: 6, kind: input, shape index: {}]   ;;  %s1467_s7 = inlined_call_operand.hbm [shape: f32[32,256], index: 7, kind: input, shape index: {}]   ;;  %s1468_s8 = inlined_call_operand.vmem [shape: f32[1,128], index: 8, kind: input, shape index: {}]   ;;  %s1469_s9 = inlined_call_operand.vmem [shape: f32[512,128], index: 9, kind: input, shape index: {}]   ;;  %s1470_s10 = inlined_call_operand.vmem [shape: f32[1,128], index: 10, kind: input, shape index: {}]   ;;  %s1471_s11 = inlined_call_operand.hbm [shape: f32[8,128], index: 11, kind: output, shape index: {}]  }
   0x1   :  { %17 = vsyncpa [#allocation6], 0 }
   0x2   :  { %18 = vsyncpa [#allocation4], 0  ;;  %s1125_s17 = smov [#allocation2]   ;;  %s1053_s21 = scalar_lea.hbm %s1466_s6, 512 }
   0x3   :  { %s66_s18 = sshll.u32 %s1125_s17, 4  ;;  %p1054_p0 = scmp.ne.s32.totalorder %s1466_s6, %s1053_s21  ;;  %s67_s18 = int_to_ptr.vmem [resolvable:$true] %s66_s18 }
   0x4   :  { %p1057_p1 = scmp.lt.u32.totalorder %s1053_s21, %s1466_s6 }
   0x6   :  { %p1059_p2 = pnand %p1057_p1, %p1054_p0 }
   0x8   :  { %1062 = shalt.err (!%p1059_p2)
}
   0x9   :  { %s1063_s26 = scalar_lea.vmem %s67_s18, 512  ;;  %p1068_p4 = scmp.lt.s32.totalorder %s67_s18, %s67_s18 }
   0xa   :  { %p1064_p3 = scmp.ne.s32.totalorder %s67_s18, %s1063_s26  ;;  %p1069_p5 = scmp.lt.s32.totalorder %s1063_s26, %s1063_s26 }
   0xc   :  { %p1070_p6 = por %p1069_p5, %p1068_p4 }
   0xe   :  { %p1071_p7 = pnand %p1070_p6, %p1064_p3 }
  0x10   :  { %1074 = shalt.err (!%p1071_p7)
}
  0x11   :  { %s1126_s27 = smov 128   ;;  %s1127_s28 = smov 8  }
  0x12   :  { %72 = dma.hbm_to_vmem [thread:$0]  %s1466_s6, 512, %s67_s18, [#allocation3], %s1126_s27, %s1126_s27, %s1127_s28  }
  0x13   :  { %s1128_s12 = smov [#allocation5]   ;;  %s1075_s16 = scalar_lea.hbm %s1467_s7, 1024 }
  0x14   :  { %s78_s13 = sshll.u32 %s1128_s12, 4  ;;  %p1076_p8 = scmp.ne.s32.totalorder %s1467_s7, %s1075_s16  ;;  %s79_s13 = int_to_ptr.vmem [resolvable:$true] %s78_s13 }
  0x15   :  { %p1079_p9 = scmp.lt.u32.totalorder %s1075_s16, %s1467_s7 }
  0x17   :  { %p1081_p10 = pnand %p1079_p9, %p1076_p8 }
  0x19   :  { %1084 = shalt.err (!%p1081_p10)
}
  0x1a   :  { %s1085_s22 = scalar_lea.vmem %s79_s13, 1024  ;;  %p1090_p12 = scmp.lt.s32.totalorder %s79_s13, %s79_s13 }
  0x1b   :  { %p1086_p11 = scmp.ne.s32.totalorder %s79_s13, %s1085_s22  ;;  %p1091_p13 = scmp.lt.s32.totalorder %s1085_s22, %s1085_s22 }
  0x1d   :  { %p1092_p0 = por %p1091_p13, %p1090_p12 }
  0x1f   :  { %p1093_p1 = pnand %p1092_p0, %p1086_p11 }
  0x21   :  { %1096 = shalt.err (!%p1093_p1)
}
  0x22   :  { %s1129_s6 = smov 256   ;;  %s1130_s18 = smov 16  }
  0x23   :  { %84 = dma.hbm_to_vmem [thread:$0]  %s1467_s7, 1024, %s79_s13, [#allocation6], %s1129_s6, %s1129_s6, %s1130_s18  }
  0x24   :  { %1119 = dma.done.wait [#allocation3], 512  }
  0x25   :  { %1120 = vsyncadd [#allocation3], 4294966784 }
  0x26   :  { %1121 = dma.done.wait [#allocation6], 1024  }
  0x27   :  { %1122 = vsyncadd [#allocation6], 4294966272  ;;  %v1131_v0 = vmov 0.0|0.0   ;;  %vm1132_vm0 = vmmov 0   ;;  %v1133_v1 = vmov 0.0   ;;  %v167_v2 = vld [vmem:[#allocation2] sm:$0xff] }
  0x28   :  { %945 = vmatprep.subr.bf16.mxu0 %v1131_v0  ;;  %951 = vmatprep.subr.bf16.mxu1 %v1131_v0  ;;  %v168_v3 = vld [vmem:[#allocation2 + $0x8] sm:$0xff]  ;;  %v159_v4 = vld [vmem:[#allocation5] sm:$0xff]  ;;  %v161_v6 = vld [vmem:[#allocation5 + $0x10] sm:$0xff]  ;;  %vm178_vm1 = vcmask 261120   ;;  %s1134_s30 = smov [#allocation7]  }
  0x29   :  { %920 = vmatprep.mubr.msk.f32.mxu0 %vm1132_vm0, %v1133_v1  ;;  %931 = vmatprep.mubr.msk.f32.mxu1 %vm1132_vm0, %v1133_v1  ;;  %v946_v5 = vpack.c.bf16 %v168_v3, %v167_v2  ;;  %v169_v7 = vld [vmem:[#allocation2 + $0x10] sm:$0xff]  ;;  %v170_v8 = vld [vmem:[#allocation2 + $0x18] sm:$0xff]  ;;  %v952_v9 = vpack.c.bf16 %v161_v6, %v159_v4  ;;  %v163_v10 = vld [vmem:[#allocation5 + $0x20] sm:$0xff]  ;;  %s775_s12 = sshll.u32 %s1134_s30, 4  ;;  %s776_s12 = int_to_ptr.vmem [resolvable:$true] %s775_s12 }
  0x2a   :  { %v165_v11 = vld [vmem:[#allocation5 + $0x30] sm:$0xff]  ;;  %v949_v13 = vpack.c.bf16 %v170_v8, %v169_v7  ;;  %v815_v14 = vld [vmem:[%s1461_s1 + $0x18] sm:$0xff]  ;;  %v162_v16 = vld [vmem:[#allocation5 + $0x18] sm:$0xff]  ;;  %p1102_p3 = scmp.lt.s32.totalorder %s776_s12, %s776_s12 }
  0x2b   :  { %v152_v12 = vld [vmem:[%s1460_s0] sm:$0xff]  ;;  %947 = vmatpush3.bf16.msra.mxu0 %v946_v5  ;;  %v160_v15 = vld [vmem:[#allocation5 + $0x8] sm:$0xff]  ;;  %953 = vmatpush3.bf16.msra.mxu1 %v952_v9  ;;  %v955_v17 = vpack.c.bf16 %v165_v11, %v163_v10  ;;  %v166_v21 = vld [vmem:[#allocation5 + $0x38] sm:$0xff] }
  0x2c   :  { %948 = vmatprep.subr.bf16.mxu0 %v1131_v0  ;;  %954 = vmatprep.subr.bf16.mxu1 %v1131_v0  ;;  %v958_v18 = vpack.c.bf16 %v162_v16, %v160_v15  ;;  %v154_v19 = vadd.f32 %v815_v14, %v152_v12  ;;  %v164_v20 = vld [vmem:[#allocation5 + $0x28] sm:$0xff]  ;;  %v816_v22 = vld [vmem:[%s1462_s2 + $0x8] sm:$0xff]  ;;  %v573_v24 = vld [vmem:[%s1469_s9 + $0x80] sm:$0xff]  ;;  %s1097_s2 = scalar_lea.vmem %s776_s12, 128 }
  0x2d   :  { %v961_v23 = vpack.c.bf16 %v166_v21, %v164_v20  ;;  %v574_v25 = vld [vmem:[%s1469_s9 + $0x88] sm:$0xff]  ;;  %v557_v27 = vld [vmem:[%s1469_s9] sm:$0xff]  ;;  %v575_v30 = vld [vmem:[%s1469_s9 + $0x90] sm:$0xff]  ;;  %p1098_p2 = scmp.ne.s32.totalorder %s776_s12, %s1097_s2  ;;  %p1103_p4 = scmp.lt.s32.totalorder %s1097_s2, %s1097_s2 }
  0x2e   :  { %v979_v26 = vpack.c.bf16 %v574_v25, %v573_v24  ;;  %v558_v28 = vld [vmem:[%s1469_s9 + $0x8] sm:$0xff]  ;;  %v576_v31 = vld [vmem:[%s1469_s9 + $0x98] sm:$0xff]  ;;  %v817_v32 = vld [vmem:[%s1463_s3 + $0x20] sm:$0xff] }
  0x2f   :  { %950 = vmatpush3.bf16.msra.mxu0 %v949_v13  ;;  %956 = vmatpush3.bf16.msra.mxu1 %v955_v17  ;;  %v819_v29 = vld [vmem:[%s1465_s5 + $0x28] sm:$0xff]  ;;  %v605_v33 = vld [vmem:[%s1469_s9 + $0x180] sm:$0xff]  ;;  %v981_v35 = vpack.c.bf16 %v558_v28, %v557_v27  ;;  %v983_v36 = vpack.c.bf16 %v576_v31, %v575_v30  ;;  %v559_v37 = vld [vmem:[%s1469_s9 + $0x10] sm:$0xff]  ;;  %p1104_p5 = por %p1103_p4, %p1102_p3 }
  0x30   :  { %957 = vmatprep.subr.bf16.mxu0 %v1131_v0  ;;  %964 = vmatprep.subr.bf16.mxu1 %v958_v18  ;;  %v606_v34 = vld [vmem:[%s1469_s9 + $0x188] sm:$0xff]  ;;  %v560_v38 = vld [vmem:[%s1469_s9 + $0x18] sm:$0xff]  ;;  %v589_v40 = vld [vmem:[%s1469_s9 + $0x100] sm:$0xff] }
  0x31   :  { %v1011_v39 = vpack.c.bf16 %v606_v34, %v605_v33  ;;  %v590_v41 = vld [vmem:[%s1469_s9 + $0x108] sm:$0xff]  ;;  %v607_v42 = vld [vmem:[%s1469_s9 + $0x190] sm:$0xff]  ;;  %v608_v43 = vld [vmem:[%s1469_s9 + $0x198] sm:$0xff]  ;;  %v985_v44 = vpack.c.bf16 %v560_v38, %v559_v37  ;;  %p1105_p6 = pnand %p1104_p5, %p1098_p2 }
  0x32   :  { %921 = vmatmul.mubr.msk.f32.vlgmr.msra.gmra.mrb[0].mxu0 %vm178_vm1, %v154_v19  ;;  %932 = vmatmul.mubr.msk.f32.vlgmr.msra.gmra.mrb[0].mxu1 %vm178_vm1, %v816_v22  ;;  %v818_v45 = vld [vmem:[%s1464_s4 + $0x10] sm:$0xff]  ;;  %v1013_v46 = vpack.c.bf16 %v590_v41, %v589_v40  ;;  %v1015_v47 = vpack.c.bf16 %v608_v43, %v607_v42  ;;  %v592_v49 = vld [vmem:[%s1469_s9 + $0x118] sm:$0xff]  ;;  %v609_v50 = vld [vmem:[%s1469_s9 + $0x1a0] sm:$0xff] }
  0x33   :  { %959 = vmatpush3.bf16.msra.mxu0 %v958_v18  ;;  %966 = vmatpush1.bf16.msra.mxu1 %v952_v9  ;;  %v591_v48 = vld [vmem:[%s1469_s9 + $0x110] sm:$0xff]  ;;  %v610_v51 = vld [vmem:[%s1469_s9 + $0x1a8] sm:$0xff]  ;;  %v577_v54 = vld [vmem:[%s1469_s9 + $0xa0] sm:$0xff] }
  0x34   :  { %960 = vmatprep.subr.bf16.mxu0 %v1131_v0  ;;  %968 = vmatprep.subr.bf16.mxu1 %v961_v23  ;;  %v1017_v52 = vpack.c.bf16 %v592_v49, %v591_v48  ;;  %v1019_v53 = vpack.c.bf16 %v610_v51, %v609_v50  ;;  %v578_v55 = vld [vmem:[%s1469_s9 + $0xa8] sm:$0xff]  ;;  %v593_v56 = vld [vmem:[%s1469_s9 + $0x120] sm:$0xff]  ;;  %v611_v63 = vld [vmem:[%s1469_s9 + $0x1b0] sm:$0xff] }
  0x35   :  { %942 = vmatprep.mubr.msk.f32.mxu0 %vm1132_vm0, %v1133_v1  ;;  %465 = vmatprep.mubr.f32.mxu1 %v1133_v1  ;;  %v987_v57 = vpack.c.bf16 %v578_v55, %v577_v54  ;;  %v594_v58 = vld [vmem:[%s1469_s9 + $0x128] sm:$0xff]  ;;  %v561_v59 = vld [vmem:[%s1469_s9 + $0x20] sm:$0xff]  ;;  %v612_v0 = vld [vmem:[%s1469_s9 + $0x1b8] sm:$0xff] }
  0x36   :  { %v562_v60 = vld [vmem:[%s1469_s9 + $0x28] sm:$0xff]  ;;  %v1021_v61 = vpack.c.bf16 %v594_v58, %v593_v56  ;;  %v579_v2 = vld [vmem:[%s1469_s9 + $0xb0] sm:$0xff]  ;;  %v580_v3 = vld [vmem:[%s1469_s9 + $0xb8] sm:$0xff] }
  0x37   :  { %962 = vmatpush3.bf16.msra.mxu0 %v961_v23  ;;  %970 = vmatpush1.bf16.msra.mxu1 %v955_v17  ;;  %v989_v62 = vpack.c.bf16 %v562_v60, %v561_v59  ;;  %v595_v4 = vld [vmem:[%s1469_s9 + $0x130] sm:$0xff]  ;;  %v991_v5 = vpack.c.bf16 %v580_v3, %v579_v2  ;;  %v596_v6 = vld [vmem:[%s1469_s9 + $0x138] sm:$0xff]  ;;  %v613_v11 = vld [vmem:[%s1469_s9 + $0x1c0] sm:$0xff] }
  0x38   :  { %972 = vmatprep.subr.bf16.mxu0 %v958_v18  ;;  %980 = vmatprep.subr.bf16.mxu1 %v979_v26  ;;  %v563_v7 = vld [vmem:[%s1469_s9 + $0x30] sm:$0xff]  ;;  %v564_v8 = vld [vmem:[%s1469_s9 + $0x38] sm:$0xff]  ;;  %v614_v12 = vld [vmem:[%s1469_s9 + $0x1c8] sm:$0xff] }
  0x39   :  { %v993_v10 = vpack.c.bf16 %v564_v8, %v563_v7  ;;  %v1027_v13 = vpack.c.bf16 %v614_v12, %v613_v11  ;;  %v581_v14 = vld [vmem:[%s1469_s9 + $0xc0] sm:$0xff]  ;;  %v582_v15 = vld [vmem:[%s1469_s9 + $0xc8] sm:$0xff]  ;;  %v616_v24 = vld [vmem:[%s1469_s9 + $0x1d8] sm:$0xff] }
  0x3a   :  { %943 = vmatmul.mubr.msk.f32.vlgmr.msra.gmra.mrb[2].mxu0 %vm178_vm1, %v819_v29  ;;  %824 = vmatmul.mubr.msk.f32.vlgmr.msra.gmra.mrb[2].mxu1 %vm178_vm1, %v817_v32  ;;  %v597_v16 = vld [vmem:[%s1469_s9 + $0x140] sm:$0xff]  ;;  %v598_v18 = vld [vmem:[%s1469_s9 + $0x148] sm:$0xff]  ;;  %v583_v26 = vld [vmem:[%s1469_s9 + $0xd0] sm:$0xff] }
  0x3b   :  { %974 = vmatpush1.bf16.msra.mxu0 %v952_v9  ;;  %539 = vmatprep.mubr.f32.mxu0 %v1133_v1  ;;  %v1023_v1 = vpack.c.bf16 %v612_v0, %v611_v63  ;;  %v1025_v9 = vpack.c.bf16 %v596_v6, %v595_v4  ;;  %v565_v19 = vld [vmem:[%s1469_s9 + $0x40] sm:$0xff]  ;;  %v566_v20 = vld [vmem:[%s1469_s9 + $0x48] sm:$0xff]  ;;  %v1029_v21 = vpack.c.bf16 %v598_v18, %v597_v16  ;;  %v584_v27 = vld [vmem:[%s1469_s9 + $0xd8] sm:$0xff] }
  0x3c   :  { %976 = vmatprep.subr.bf16.mxu0 %v961_v23  ;;  %982 = vmatpush3.bf16.msra.mxu1 %v981_v35  ;;  %v997_v22 = vpack.c.bf16 %v566_v20, %v565_v19  ;;  %v615_v23 = vld [vmem:[%s1469_s9 + $0x1d0] sm:$0xff]  ;;  %v999_v29 = vpack.c.bf16 %v584_v27, %v583_v26  ;;  %v600_v30 = vld [vmem:[%s1469_s9 + $0x158] sm:$0xff]  ;;  %v617_v35 = vld [vmem:[%s1469_s9 + $0x1e0] sm:$0xff] }
  0x3d   :  { %984 = vmatprep.subr.bf16.mxu1 %v983_v36  ;;  %v1031_v25 = vpack.c.bf16 %v616_v24, %v615_v23  ;;  %v599_v28 = vld [vmem:[%s1469_s9 + $0x150] sm:$0xff]  ;;  %v568_v32 = vld [vmem:[%s1469_s9 + $0x58] sm:$0xff]  ;;  %v618_v36 = vld [vmem:[%s1469_s9 + $0x1e8] sm:$0xff] }
  0x3e   :  { %v567_v31 = vld [vmem:[%s1469_s9 + $0x50] sm:$0xff]  ;;  %v1033_v33 = vpack.c.bf16 %v600_v30, %v599_v28  ;;  %v1035_v37 = vpack.c.bf16 %v618_v36, %v617_v35  ;;  %v585_v38 = vld [vmem:[%s1469_s9 + $0xe0] sm:$0xff]  ;;  %v602_v42 = vld [vmem:[%s1469_s9 + $0x168] sm:$0xff] }
  0x3f   :  { %978 = vmatpush1.bf16.msra.mxu0 %v955_v17  ;;  %v995_v17 = vpack.c.bf16 %v582_v15, %v581_v14  ;;  %v1001_v34 = vpack.c.bf16 %v568_v32, %v567_v31  ;;  %v601_v40 = vld [vmem:[%s1469_s9 + $0x160] sm:$0xff]  ;;  %v620_v48 = vld [vmem:[%s1469_s9 + $0x1f8] sm:$0xff]  ;;  %v587_v50 = vld [vmem:[%s1469_s9 + $0xf0] sm:$0xff] }
  0x40   :  { %1012 = vmatprep.subr.bf16.mxu0 %v1011_v39  ;;  %986 = vmatpush3.bf16.msra.mxu1 %v985_v44  ;;  %v586_v39 = vld [vmem:[%s1469_s9 + $0xe8] sm:$0xff]  ;;  %v569_v43 = vld [vmem:[%s1469_s9 + $0x60] sm:$0xff]  ;;  %v588_v51 = vld [vmem:[%s1469_s9 + $0xf8] sm:$0xff] }
  0x41   :  { %988 = vmatprep.subr.bf16.mxu1 %v987_v57  ;;  %v1003_v41 = vpack.c.bf16 %v586_v39, %v585_v38  ;;  %v570_v44 = vld [vmem:[%s1469_s9 + $0x68] sm:$0xff]  ;;  %v604_v54 = vld [vmem:[%s1469_s9 + $0x178] sm:$0xff]  ;;  %v571_v55 = vld [vmem:[%s1469_s9 + $0x70] sm:$0xff] }
  0x42   :  { %825 = vmatmul.mubr.msk.f32.vlgmr.msra.gmra.mrb[4].mxu0 %vm178_vm1, %v818_v45  ;;  %v1037_v45 = vpack.c.bf16 %v602_v42, %v601_v40  ;;  %v572_v56 = vld [vmem:[%s1469_s9 + $0x78] sm:$0xff]  ;;  %v820_v59 = vld [vmem:[%s1468_s8] ss:$0 sm:$0xff] }
  0x43   :  { %1014 = vmatpush3.bf16.msra.mxu0 %v1013_v46  ;;  %v1005_v46 = vpack.c.bf16 %v570_v44, %v569_v43  ;;  %v1009_v58 = vpack.c.bf16 %v572_v56, %v571_v55 }
  0x44   :  { %1016 = vmatprep.subr.bf16.mxu0 %v1015_v47  ;;  %990 = vmatpush3.bf16.msra.mxu1 %v989_v62  ;;  %v619_v47 = vld [vmem:[%s1469_s9 + $0x1f0] sm:$0xff] }
  0x45   :  { %992 = vmatprep.subr.bf16.mxu1 %v991_v5  ;;  %v1039_v49 = vpack.c.bf16 %v620_v48, %v619_v47 }
  0x47   :  { %1018 = vmatpush3.bf16.msra.mxu0 %v1017_v52  ;;  %v603_v52 = vld [vmem:[%s1469_s9 + $0x170] sm:$0xff] }
  0x48   :  { %1020 = vmatprep.subr.bf16.mxu0 %v1019_v53  ;;  %994 = vmatpush3.bf16.msra.mxu1 %v993_v10  ;;  %v1007_v53 = vpack.c.bf16 %v588_v51, %v587_v50  ;;  %v1041_v57 = vpack.c.bf16 %v604_v54, %v603_v52 }
  0x49   :  { %996 = vmatprep.subr.bf16.mxu1 %v995_v17 }
  0x4b   :  { %1022 = vmatpush3.bf16.msra.mxu0 %v1021_v61 }
  0x4c   :  { %1024 = vmatprep.subr.bf16.mxu0 %v1023_v1  ;;  %998 = vmatpush3.bf16.msra.mxu1 %v997_v22  ;;  %v826_v22 = vld [vmem:[%s1470_s10] ss:$0 sm:$0xff] }
  0x4d   :  { %1000 = vmatprep.subr.bf16.mxu1 %v999_v29 }
  0x4f   :  { %1026 = vmatpush3.bf16.msra.mxu0 %v1025_v9 }
  0x50   :  { %1028 = vmatprep.subr.bf16.mxu0 %v1027_v13  ;;  %1002 = vmatpush3.bf16.msra.mxu1 %v1001_v34 }
  0x51   :  { %1004 = vmatprep.subr.bf16.mxu1 %v1003_v41 }
  0x53   :  { %1030 = vmatpush3.bf16.msra.mxu0 %v1029_v21 }
  0x54   :  { %1032 = vmatprep.subr.bf16.mxu0 %v1031_v25  ;;  %1006 = vmatpush3.bf16.msra.mxu1 %v1005_v46 }
  0x55   :  { %1008 = vmatprep.subr.bf16.mxu1 %v1007_v53 }
  0x57   :  { %1034 = vmatpush3.bf16.msra.mxu0 %v1033_v33 }
  0x58   :  { %1036 = vmatprep.subr.bf16.mxu0 %v1035_v37  ;;  %1010 = vmatpush3.bf16.msra.mxu1 %v1009_v58 }
  0x5b   :  { %1038 = vmatpush3.bf16.msra.mxu0 %v1037_v45 }
  0x5c   :  { %1040 = vmatprep.subr.bf16.mxu0 %v1039_v49 }
  0x5f   :  { %1042 = vmatpush3.bf16.msra.mxu0 %v1041_v57 }
 0x105   :  { %v248_v60 = vpop.f32.mrb[0].mxu0  ;;  %v321_v63 = vpop.f32.mrb[0].mxu1 }
 0x106   :  { %v249_v61 = vadd.f32 %v820_v59, %v248_v60  ;;  %v922_v62 = vpop.f32.mrb[1].mxu0  ;;  %v933_v0 = vpop.f32.mrb[1].mxu1 }
 0x108   :  { %v546_v1 = vadd.f32 %v321_v63, %v249_v61 }
 0x10d   :  { %v394_v2 = vpop.f32.mrb[2].mxu0  ;;  %v467_v4 = vpop.f32.mrb[2].mxu1 }
 0x10e   :  { %v552_v3 = vadd.f32 %v546_v1, %v394_v2  ;;  %v944_v5 = vpop.f32.mrb[3].mxu0  ;;  %v554_v6 = vadd.f32 %v467_v4, %v249_v61  ;;  %v469_v7 = vpop.f32.mrb[3].mxu1 }
 0x10f   :  { %v547_v8 = vadd.f32 %v546_v1, %v469_v7 }
 0x110   :  { %v553_v15 = vmax.f32 %v552_v3, 0.0 }
 0x111   :  { %v548_v17 = vmax.f32 %v547_v8, 0.0 }
 0x115   :  { %v541_v9 = vpop.f32.mrb[4].mxu0 }
 0x116   :  { %v549_v10 = vadd.f32 %v541_v9, %v249_v61  ;;  %v543_v11 = vpop.f32.mrb[5].mxu0 }
 0x117   :  { %v555_v12 = vadd.f32 %v554_v6, %v543_v11 }
 0x118   :  { %v550_v13 = vadd.f32 %v549_v10, %v394_v2 }
 0x119   :  { %v556_v14 = vmax.f32 %v555_v12, 0.0 }
 0x11a   :  { %v551_v16 = vmax.f32 %v550_v13, 0.0 }
 0x11b   :  { %762 = vmatprep.mubr.f32.mxu0 %v556_v14 }
 0x11c   :  { %692 = vmatprep.mubr.f32.mxu1 %v551_v16  ;;  %763 = vmatmul.mubr.f32.vlgmr.msra.gmra.mrb[6].mxu0 %v553_v15 }
 0x11d   :  { %693 = vmatmul.mubr.f32.vlgmr.msra.gmra.mrb[4].mxu1 %v548_v17 }
 0x1ef   :  { %v909_v18 = vpop.f32.mrb[6].mxu0 }
 0x1f0   :  { %v874_v19 = vpop.f32.mrb[4].mxu1  ;;  %v910_v20 = vpop.f32.mrb[7].mxu0 }
 0x1f1   :  { %v911_v21 = vadd.f32 %v910_v20, %v909_v18  ;;  %v875_v23 = vpop.f32.mrb[5].mxu1 }
 0x1f2   :  { %v876_v24 = vadd.f32 %v875_v23, %v874_v19 }
 0x1f4   :  { %v695_v25 = vadd.f32 %v876_v24, %v826_v22 }
 0x1f6   :  { %v765_v26 = vadd.f32 %v911_v21, %v695_v25 }
 0x1f8   :  { %768 = vst [vmem:[#allocation7] sm:$0xff] %v765_v26 }
 0x1f9   :  { %1108 = shalt.err (!%p1105_p6)
}
 0x1fa   :  { %s1109_s15 = scalar_lea.hbm %s1471_s11, 128 }
 0x1fb   :  { %p1110_p7 = scmp.ne.s32.totalorder %s1471_s11, %s1109_s15  ;;  %p1113_p8 = scmp.lt.u32.totalorder %s1109_s15, %s1471_s11 }
 0x1fd   :  { %p1115_p9 = pnand %p1113_p8, %p1110_p7 }
 0x1ff   :  { %1118 = shalt.err (!%p1115_p9)
}
 0x200   :  { %778 = dma.vmem_to_hbm [thread:$0]  %s776_s12, 128, %s1471_s11, [#allocation4]  }
 0x201   :  { %1123 = dma.done.wait [#allocation4], 128  }
 0x202   :  { %1124 = vsyncadd [#allocation4], 4294967168 }
 0x203   :  { %782 = vsyncpa [#allocation3], 1 }
 0x204   :  { %783 = vsyncpa [#allocation6], 1 }
 0x205   :  { %784 = vsyncpa [#allocation4], 1 }

</bundles_post_ra>
